<compile_context>
chip_gen: v6e
topology: v6e:2x2x1
jax: 0.10.0
libtpu: 0.0.40
codegen_flags: <defaults>
</compile_context>

<pallas_src>
import functools

import jax
import jax.numpy as jnp
from jax.experimental import pallas as pl
from jax.experimental.pallas import tpu as pltpu


def _round_up(x, m):
    return ((x + m - 1) // m) * m


def _dec_tile_kernel(s_row_ref, s_col_ref, out_ref):
    # logits[j, i] = (w2·emb[j] + b) + (w1·emb[i]) via (TM,1)+(1,TN) broadcast.
    logits = s_row_ref[...] + s_col_ref[...]                     # (TM, TN) f32
    # sigmoid(x) == 0.5 * (1 + tanh(x/2)): one EUP op; mul/add land on the VPU
    # (huge slack here).  Bounded output -> edge-block garbage lanes are safe.
    out_ref[...] = (0.5 + 0.5 * jnp.tanh(0.5 * logits)).astype(out_ref.dtype)


# 2 MiB f32 output tile -> 4 MiB double-buffered (+ <2 MiB of lane/sublane-
# padded logit-vector buffers): fits v5e's 16 MiB scoped VMEM with headroom and
# is far from v7x's 32 MiB scoped / 64 MiB physical ceiling.
_OUT_TILE_BYTES = 2 * 1024 * 1024
_TN_MAX = 8192  # 32 KiB contiguous per output row DMA


def _pick_tiles(n, tile_m, tile_n):
    tn = tile_n if tile_n is not None else min(_round_up(n, 128), _TN_MAX)
    if tile_m is not None:
        tm = tile_m
    else:
        tm = max(8, (_OUT_TILE_BYTES // (tn * 4)) // 8 * 8)
        tm = min(tm, _round_up(n, 8))
    return tm, tn


@functools.partial(
    jax.jit,
    static_argnames=("emb_dim", "tile_m", "tile_n", "out_dtype",
                     "use_core_parallel"))
def stgsn_dec_forward(dyn_emb, weight, bias, emb_dim, tile_m=None, tile_n=None,
                      out_dtype=jnp.float32, use_core_parallel=False):
    """dyn_emb: (N, 2*emb_dim); weight: (1, 4*emb_dim); bias: (1,) -> (N, N)."""
    n, two_e = dyn_emb.shape
    if two_e != 2 * emb_dim:
        raise ValueError("dyn_emb second dim must be 2*emb_dim")

    emb = dyn_emb.astype(jnp.float32)
    w = weight.astype(jnp.float32).reshape(-1)               # (4E,)
    w1 = w[:two_e]                                            # pairs with column i
    w2 = w[two_e:]                                            # pairs with row j

    # Hoisted N-length logit vectors (bias folded into the row contribution).
    s_col = (emb @ w1).reshape(1, n)                          # (1, N)
    s_row = (emb @ w2 + bias.astype(jnp.float32)[0]).reshape(n, 1)  # (N, 1)

    tm, tn = _pick_tiles(n, tile_m, tile_n)
    grid = (pl.cdiv(n, tm), pl.cdiv(n, tn))

    if use_core_parallel:
        # Real 2-TensorCore sharding on v7x; the attribute lookup / lowering may
        # fail on single-TC targets — the caller falls back to plain parallel.
        dim_sem = (pltpu.CORE_PARALLEL, pltpu.ARBITRARY)
    else:
        dim_sem = ("parallel", "parallel")

    return pl.pallas_call(
        _dec_tile_kernel,
        out_shape=jax.ShapeDtypeStruct((n, n), out_dtype),
        grid_spec=pltpu.PrefetchScalarGridSpec(
            num_scalar_prefetch=0,
            grid=grid,
            in_specs=[
                pl.BlockSpec((tm, 1), lambda i, j: (i, 0)),
                pl.BlockSpec((1, tn), lambda i, j: (0, j)),
            ],
            out_specs=pl.BlockSpec((tm, tn), lambda i, j: (i, j)),
        ),
        compiler_params=pltpu.CompilerParams(dimension_semantics=dim_sem),
    )(s_row, s_col)


def run_dec(dyn_emb, weight, bias, emb_dim, **kw):
    """Try the v7x CORE_PARALLEL build first; fall back to plain parallel."""
    try:
        return jax.block_until_ready(
            stgsn_dec_forward(dyn_emb, weight, bias, emb_dim,
                              use_core_parallel=True, **kw))
    except Exception:
        return jax.block_until_ready(
            stgsn_dec_forward(dyn_emb, weight, bias, emb_dim,
                              use_core_parallel=False, **kw))


def stgsn_dec_reference_loop(dyn_emb, weight, bias, emb_dim):
    """Faithful transcription of the PyTorch per-column loop."""
    n = dyn_emb.shape[0]
    cols = []
    for i in range(n):
        cur = jnp.tile(dyn_emb[i:i + 1, :], (n, 1))           # (N, 2E)
        cat = jnp.concatenate([cur, dyn_emb], axis=1)          # (N, 4E)
        col = jax.nn.sigmoid(cat @ weight.T + bias)            # (N, 1)
        cols.append(col)
    return jnp.concatenate(cols, axis=1)                       # (N, N)


def stgsn_dec_reference_vec(dyn_emb, weight, bias, emb_dim):
    """Vectorized JAX reference (for larger shapes)."""
    two_e = 2 * emb_dim
    w1 = weight[0, :two_e]
    w2 = weight[0, two_e:]
    s_col = dyn_emb @ w1
    s_row = dyn_emb @ w2
    return jax.nn.sigmoid(s_row[:, None] + s_col[None, :] + bias[0])


if __name__ == "__main__":
    key = jax.random.PRNGKey(0)
    keys = jax.random.split(key, 6)

    # --- Small config matching the module (emb_dim=16, N=16) ----------------
    emb_dim = 16
    num_nodes = 16
    fan_in = 4 * emb_dim
    bound = 1.0 / jnp.sqrt(jnp.float32(fan_in))
    weight = jax.random.uniform(keys[0], (1, fan_in), jnp.float32, -bound, bound)
    bias = jax.random.uniform(keys[1], (1,), jnp.float32, -bound, bound)
    dyn_emb = jax.random.normal(keys[2], (num_nodes, 2 * emb_dim), jnp.float32)

    adj = run_dec(dyn_emb, weight, bias, emb_dim)
    adj_loop = stgsn_dec_reference_loop(dyn_emb, weight, bias, emb_dim)
    assert adj.shape == (num_nodes, num_nodes)
    assert jnp.allclose(adj, adj_loop, atol=1e-5, rtol=1e-5), "small config mismatch"

    # Optional bf16 output (numerics-policy knob; ~2x fewer bytes written).
    adj_bf16 = run_dec(dyn_emb, weight, bias, emb_dim, out_dtype=jnp.bfloat16)
    assert jnp.allclose(adj_bf16.astype(jnp.float32), adj_loop, atol=1e-2), \
        "bf16 output mismatch"

    # --- Larger, non-tile-aligned config ------------------------------------
    emb_dim2 = 32
    n2 = 300
    fan_in2 = 4 * emb_dim2
    bound2 = 1.0 / jnp.sqrt(jnp.float32(fan_in2))
    weight2 = jax.random.uniform(keys[3], (1, fan_in2), jnp.float32, -bound2, bound2)
    bias2 = jax.random.uniform(keys[4], (1,), jnp.float32, -bound2, bound2)
    dyn_emb2 = jax.random.normal(keys[5], (n2, 2 * emb_dim2), jnp.float32)
    adj2_ref = stgsn_dec_reference_vec(dyn_emb2, weight2, bias2, emb_dim2)

    # Default (full-row) tiling: single column block, masked partial edges.
    adj2 = run_dec(dyn_emb2, weight2, bias2, emb_dim2)
    assert adj2.shape == (n2, n2)
    assert jnp.allclose(adj2, adj2_ref, atol=1e-5, rtol=1e-5), "full-row tiling mismatch"

    # Forced small tiles: multi-tile grid with partial edge blocks in both dims.
    adj2_t = run_dec(dyn_emb2, weight2, bias2, emb_dim2, tile_m=128, tile_n=128)
    assert jnp.allclose(adj2_t, adj2_ref, atol=1e-5, rtol=1e-5), "multi-tile mismatch"

    print("KERNEL_OK")
</pallas_src>

<mosaic_0001>
module attributes {stable_mosaic.version = 11 : i64} {
  func.func @_dec_tile_kernel(%arg0: i32, %arg1: i32, %arg2: memref<16x1xf32, #tpu.memory_space<vmem>>, %arg3: memref<1x128xf32, #tpu.memory_space<vmem>>, %arg4: memref<16x128xf32, #tpu.memory_space<vmem>>) attributes {dimension_semantics = [#tpu.dimension_semantics<core_parallel>, #tpu.dimension_semantics<arbitrary>], iteration_bounds = array<i64: 1, 1>, scalar_prefetch = 0 : i64, scratch_operands = 0 : i64, tpu.core_type = #tpu.core_type<tc>, window_params = [{transform_indices = @transform_0, window_bounds = array<i64: 16, 1>}, {transform_indices = @transform_1, window_bounds = array<i64: 1, 128>}, {transform_indices = @transform_2, window_bounds = array<i64: 16, 128>}]} {
    %c0 = arith.constant 0 : index
    %c0_0 = arith.constant 0 : index
    %0 = vector.load %arg2[%c0, %c0_0] : memref<16x1xf32, #tpu.memory_space<vmem>>, vector<16x1xf32>
    %c0_1 = arith.constant 0 : index
    %c0_2 = arith.constant 0 : index
    %1 = vector.load %arg3[%c0_1, %c0_2] : memref<1x128xf32, #tpu.memory_space<vmem>>, vector<1x128xf32>
    %2 = vector.broadcast %0 : vector<16x1xf32> to vector<16x128xf32>
    %3 = vector.broadcast %1 : vector<1x128xf32> to vector<16x128xf32>
    %4 = arith.addf %2, %3 : vector<16x128xf32>
    %cst = arith.constant 5.000000e-01 : f32
    %5 = vector.broadcast %cst : f32 to vector<16x128xf32>
    %6 = arith.mulf %5, %4 : vector<16x128xf32>
    %7 = math.tanh %6 : vector<16x128xf32>
    %cst_3 = arith.constant 5.000000e-01 : f32
    %8 = vector.broadcast %cst_3 : f32 to vector<16x128xf32>
    %9 = arith.mulf %8, %7 : vector<16x128xf32>
    %cst_4 = arith.constant 5.000000e-01 : f32
    %10 = vector.broadcast %cst_4 : f32 to vector<16x128xf32>
    %11 = arith.addf %10, %9 : vector<16x128xf32>
    %c0_5 = arith.constant 0 : index
    %c0_6 = arith.constant 0 : index
    %12 = vector.load %arg4[%c0_5, %c0_6] : memref<16x128xf32, #tpu.memory_space<vmem>>, vector<16x128xf32>
    tpu.vector_store %arg4[%c0_5, %c0_6], %11 {strides = array<i32>} : memref<16x128xf32, #tpu.memory_space<vmem>>, vector<16x128xf32>,
    return
  }
  func.func @transform_0(%arg0: i32, %arg1: i32) -> (i32, i32) {
    %c0_i32 = arith.constant 0 : i32
    %c0_i32_0 = arith.constant 0 : i32
    return %arg0, %c0_i32 : i32, i32
  }
  func.func @transform_1(%arg0: i32, %arg1: i32) -> (i32, i32) {
    %c0_i32 = arith.constant 0 : i32
    %c0_i32_0 = arith.constant 0 : i32
    return %c0_i32, %arg1 : i32, i32
  }
  func.func @transform_2(%arg0: i32, %arg1: i32) -> (i32, i32) {
    %c0_i32 = arith.constant 0 : i32
    return %arg0, %arg1 : i32, i32
  }
}

module attributes {stable_mosaic.version = 11 : i64} {
  func.func @_dec_tile_kernel(%arg0: i32, %arg1: i32, %arg2: memref<16x1xf32, #tpu.memory_space<vmem>>, %arg3: memref<1x128xf32, #tpu.memory_space<vmem>>, %arg4: memref<16x128xf32, #tpu.memory_space<vmem>>) attributes {dimension_semantics = [#tpu.dimension_semantics<parallel>, #tpu.dimension_semantics<parallel>], iteration_bounds = array<i64: 1, 1>, scalar_prefetch = 0 : i64, scratch_operands = 0 : i64, tpu.core_type = #tpu.core_type<tc>, window_params = [{transform_indices = @transform_0, window_bounds = array<i64: 16, 1>}, {transform_indices = @transform_1, window_bounds = array<i64: 1, 128>}, {transform_indices = @transform_2, window_bounds = array<i64: 16, 128>}]} {
    %c0 = arith.constant 0 : index
    %c0_0 = arith.constant 0 : index
    %0 = vector.load %arg2[%c0, %c0_0] : memref<16x1xf32, #tpu.memory_space<vmem>>, vector<16x1xf32>
    %c0_1 = arith.constant 0 : index
    %c0_2 = arith.constant 0 : index
    %1 = vector.load %arg3[%c0_1, %c0_2] : memref<1x128xf32, #tpu.memory_space<vmem>>, vector<1x128xf32>
    %2 = vector.broadcast %0 : vector<16x1xf32> to vector<16x128xf32>
    %3 = vector.broadcast %1 : vector<1x128xf32> to vector<16x128xf32>
    %4 = arith.addf %2, %3 : vector<16x128xf32>
    %cst = arith.constant 5.000000e-01 : f32
    %5 = vector.broadcast %cst : f32 to vector<16x128xf32>
    %6 = arith.mulf %5, %4 : vector<16x128xf32>
    %7 = math.tanh %6 : vector<16x128xf32>
    %cst_3 = arith.constant 5.000000e-01 : f32
    %8 = vector.broadcast %cst_3 : f32 to vector<16x128xf32>
    %9 = arith.mulf %8, %7 : vector<16x128xf32>
    %cst_4 = arith.constant 5.000000e-01 : f32
    %10 = vector.broadcast %cst_4 : f32 to vector<16x128xf32>
    %11 = arith.addf %10, %9 : vector<16x128xf32>
    %c0_5 = arith.constant 0 : index
    %c0_6 = arith.constant 0 : index
    %12 = vector.load %arg4[%c0_5, %c0_6] : memref<16x128xf32, #tpu.memory_space<vmem>>, vector<16x128xf32>
    tpu.vector_store %arg4[%c0_5, %c0_6], %11 {strides = array<i32>} : memref<16x128xf32, #tpu.memory_space<vmem>>, vector<16x128xf32>,
    return
  }
  func.func @transform_0(%arg0: i32, %arg1: i32) -> (i32, i32) {
    %c0_i32 = arith.constant 0 : i32
    %c0_i32_0 = arith.constant 0 : i32
    return %arg0, %c0_i32 : i32, i32
  }
  func.func @transform_1(%arg0: i32, %arg1: i32) -> (i32, i32) {
    %c0_i32 = arith.constant 0 : i32
    %c0_i32_0 = arith.constant 0 : i32
    return %c0_i32, %arg1 : i32, i32
  }
  func.func @transform_2(%arg0: i32, %arg1: i32) -> (i32, i32) {
    %c0_i32 = arith.constant 0 : i32
    return %arg0, %arg1 : i32, i32
  }
}

</mosaic_0001>

<bundles_post_ra>
// kernel: stgsn_dec_forward.1
= control target key start
LH: loop header
LB: loop body
LE: loop exit
PB: predicated region body
PF: predicated region fallthrough
CT: control target
= control target key end

     0   :  { %s146_s9 = sld [smem:[#allocation0]]   ;;  %s162_s0 = inlined_call_operand.vmem [shape: f32[16,1], index: 0, kind: input, shape index: {}]   ;;  %s163_s1 = inlined_call_operand.vmem [shape: f32[1,16], index: 1, kind: input, shape index: {}]   ;;  %s164_s2 = inlined_call_operand.hbm [shape: f32[16,16], index: 2, kind: output, shape index: {}]  }
   0x6   :  { %s88_s10 = sshll.u32 %s146_s9, 1 }
   0x7   :  { %7 = vsyncpa [#allocation3], 0  ;;  %v127_v0 = vmov 0   ;;  %p24_p0 = scmp.lt.s32.totalorder %s88_s10, 1  ;;  %v90_v3 = vld [vmem:[%s163_s1] ss:$0 sm:$0xff] }
   0x8   :  { %98 = vset.pattern.permute.xlu0 %v127_v0  ;;  %s128_s17 = smov [#allocation2]  }
   0x9   :  { %s166_s10 = smov (!%p24_p0, %s88_s10), 1  ;;  %s69_s18 = sshll.u32 %s128_s17, 4  ;;  %s70_s18 = int_to_ptr.vmem [resolvable:$true] %s69_s18 }
   0xa   :  { %s89_s11 = sshll.u32 %s166_s10, 3  ;;  %s103_s21 = scalar_lea.vmem %s70_s18, 256 }
   0xb   :  { %s27_s14 = scalar_lea.vmem %s162_s0, %s89_s11  ;;  %s93_s0 = sshll.u32 %s146_s9, 8 }
   0xc   :  { %v30_v1 = vld [vmem:[%s27_s14] sm:$0xff]  ;;  %v31_v2 = vld [vmem:[%s27_s14 + $0x8] sm:$0xff]  ;;  %s68_s1 = scalar_lea.hbm %s164_s2, %s93_s0  ;;  %p104_p1 = scmp.ne.s32.totalorder %s70_s18, %s103_s21 }
   0xd   :  { %35 = vperm.xlu0 %98, %v30_v1   ;;  %p108_p2 = scmp.lt.s32.totalorder %s70_s18, %s70_s18  ;;  %p109_p3 = scmp.lt.s32.totalorder %s103_s21, %s103_s21 }
   0xf   :  { %p110_p4 = por %p109_p3, %p108_p2 }
  0x11   :  { %40 = vperm.xlu0 %98, %v31_v2   ;;  %p111_p5 = pnand %p110_p4, %p104_p1 }
  0x88   :  { %v36_v4 = vpop.permute.xlu0 %35 }
  0x89   :  { %v49_v5 = vadd.f32 %v90_v3, %v36_v4 }
  0x8b   :  { %v51_v6 = vmul.f32 0.5, %v49_v5 }
  0x8c   :  { %v41_v7 = vpop.permute.xlu0 %40 }
  0x8d   :  { %99 = vtanh.f32 %v51_v6  ;;  %v50_v8 = vadd.f32 %v90_v3, %v41_v7 }
  0x8f   :  { %v52_v9 = vmul.f32 0.5, %v50_v8 }
  0x91   :  { %101 = vtanh.f32 %v52_v9 }
  0x9a   :  { %v100_v10 = vpop.eup %99 }
  0x9b   :  { %v55_v11 = vmul.f32 0.5, %v100_v10 }
  0x9d   :  { %v57_v12 = vadd.f32 0.5, %v55_v11 }
  0x9e   :  { %v102_v13 = vpop.eup %101 }
  0x9f   :  { %59 = vst [vmem:[#allocation2] sm:$0xff] %v57_v12  ;;  %v56_v14 = vmul.f32 0.5, %v102_v13 }
  0xa1   :  { %v58_v15 = vadd.f32 0.5, %v56_v14 }
  0xa3   :  { %60 = vst [vmem:[#allocation2 + $0x8] sm:$0xff] %v58_v15 }
  0xa4   :  { %114 = shalt.err (!%p111_p5)
}
  0xa5   :  { %s115_s22 = scalar_lea.hbm %s68_s1, 256  ;;  %s117_s25 = scalar_lea.hbm %s164_s2, 256 }
  0xa6   :  { %p116_p6 = scmp.ne.s32.totalorder %s68_s1, %s115_s22  ;;  %p119_p7 = scmp.lt.s32.totalorder %s117_s25, %s115_s22 }
  0xa8   :  { %p121_p8 = pnand %p119_p7, %p116_p6 }
  0xaa   :  { %124 = shalt.err (!%p121_p8)
}
  0xab   :  { %s129_s26 = smov 128   ;;  %s130_s27 = smov 8  }
  0xac   :  { %75 = dma.vmem_to_hbm [thread:$0]  %s70_s18, 256, %s68_s1, [#allocation3], %s129_s26, %s129_s26, %s130_s27  }
  0xad   :  { %125 = dma.done.wait [#allocation3], 256  }
  0xae   :  { %126 = vsyncadd [#allocation3], 4294967040 }
  0xaf   :  { %79 = vsyncpa [#allocation3], 1 }

// kernel: stgsn_dec_forward.1
= control target key start
LH: loop header
LB: loop body
LE: loop exit
PB: predicated region body
PF: predicated region fallthrough
CT: control target
= control target key end

     0   :  { %v91_v1 = vmov 0   ;;  %s122_s0 = inlined_call_operand.vmem [shape: f32[16,1], index: 0, kind: input, shape index: {}]   ;;  %s123_s1 = inlined_call_operand.vmem [shape: f32[1,16], index: 1, kind: input, shape index: {}]   ;;  %s124_s2 = inlined_call_operand.hbm [shape: f32[16,16], index: 2, kind: output, shape index: {}]  }
   0x1   :  { %v12_v0 = vld [vmem:[%s122_s0] sm:$0xff]  ;;  %64 = vset.pattern.permute.xlu0 %v91_v1 }
   0x2   :  { %7 = vsyncpa [#allocation3], 0  ;;  %17 = vperm.xlu0 %64, %v12_v0   ;;  %v13_v2 = vld [vmem:[%s122_s0 + $0x8] sm:$0xff]  ;;  %v59_v3 = vld [vmem:[%s123_s1] ss:$0 sm:$0xff]  ;;  %s92_s15 = smov [#allocation2]  }
   0x3   :  { %s48_s16 = sshll.u32 %s92_s15, 4  ;;  %s49_s16 = int_to_ptr.vmem [resolvable:$true] %s48_s16 }
   0x4   :  { %s69_s0 = scalar_lea.vmem %s49_s16, 256  ;;  %p74_p1 = scmp.lt.s32.totalorder %s49_s16, %s49_s16 }
   0x5   :  { %p70_p0 = scmp.ne.s32.totalorder %s49_s16, %s69_s0  ;;  %p75_p2 = scmp.lt.s32.totalorder %s69_s0, %s69_s0 }
   0x6   :  { %22 = vperm.xlu0 %64, %v13_v2  }
   0x7   :  { %p76_p3 = por %p75_p2, %p74_p1 }
   0x9   :  { %p77_p4 = pnand %p76_p3, %p70_p0 }
  0x7d   :  { %v18_v4 = vpop.permute.xlu0 %17 }
  0x7e   :  { %v31_v5 = vadd.f32 %v59_v3, %v18_v4 }
  0x80   :  { %v33_v6 = vmul.f32 0.5, %v31_v5 }
  0x81   :  { %v23_v7 = vpop.permute.xlu0 %22 }
  0x82   :  { %65 = vtanh.f32 %v33_v6  ;;  %v32_v8 = vadd.f32 %v59_v3, %v23_v7 }
  0x84   :  { %v34_v9 = vmul.f32 0.5, %v32_v8 }
  0x86   :  { %67 = vtanh.f32 %v34_v9 }
  0x8f   :  { %v66_v10 = vpop.eup %65 }
  0x90   :  { %v37_v11 = vmul.f32 0.5, %v66_v10 }
  0x92   :  { %v39_v12 = vadd.f32 0.5, %v37_v11 }
  0x93   :  { %v68_v13 = vpop.eup %67 }
  0x94   :  { %41 = vst [vmem:[#allocation2] sm:$0xff] %v39_v12  ;;  %v38_v14 = vmul.f32 0.5, %v68_v13 }
  0x96   :  { %v40_v15 = vadd.f32 0.5, %v38_v14 }
  0x98   :  { %42 = vst [vmem:[#allocation2 + $0x8] sm:$0xff] %v40_v15 }
  0x99   :  { %80 = shalt.err (!%p77_p4)
}
  0x9a   :  { %s93_s1 = smov 128   ;;  %s94_s17 = smov 8  }
  0x9b   :  { %54 = dma.vmem_to_hbm [thread:$0]  %s49_s16, 256, %s124_s2, [#allocation3], %s93_s1, %s93_s1, %s94_s17  }
  0x9c   :  { %89 = dma.done.wait [#allocation3], 256  }
  0x9d   :  { %90 = vsyncadd [#allocation3], 4294967040 }
  0x9e   :  { %58 = vsyncpa [#allocation3], 1 }

</bundles_post_ra>
